<compile_context>
chip_gen: v6e
topology: v6e:2x2x1
jax: 0.10.0
libtpu: 0.0.40
codegen_flags: <defaults>
</compile_context>

<pallas_src>
import functools

import jax
import jax.numpy as jnp
from jax.experimental import pallas as pl
from jax.experimental.pallas import tpu as pltpu


def _round_up(x: int, m: int) -> int:
    return (x + m - 1) // m * m


def _pad2d(a, rows: int, cols: int):
    r, c = a.shape
    if r == rows and c == cols:
        return a
    return jnp.pad(a, ((0, rows - r), (0, cols - c)))


def _applier_kernel(x_ref, w_ref, b_ref, add_ref, o_ref):
    # Fused hot path: MXU matmul (f32 accumulation) + bias + residual add (VPU).
    acc = jnp.dot(x_ref[...], w_ref[...], preferred_element_type=jnp.float32)
    acc = acc + b_ref[...]                          # bias broadcast over rows (f32)
    acc = acc + add_ref[...].astype(jnp.float32)    # residual "add" input
    o_ref[...] = acc.astype(o_ref.dtype)


def applier_forward(x, add, w, b, *, tm: int | None = None, matmul_dtype=None):
    """Applier forward: Linear(H, H)(x) + add.

    x, add : [B, S, H]
    w      : [H, H]  (stored as in x out, i.e. already transposed vs torch)
    b      : [H]
    """
    B, S, H = x.shape
    M = B * S
    out_dtype = x.dtype
    mm_dtype = jnp.dtype(matmul_dtype) if matmul_dtype is not None else jnp.dtype(x.dtype)
    io_bytes = jnp.dtype(out_dtype).itemsize
    mm_bytes = mm_dtype.itemsize

    # Row-tile size: multiple of 8, default 512 (f32) / 1024 (narrow dtypes).
    if tm is None:
        tm = 512 if mm_bytes >= 4 else 1024
    TM = min(_round_up(tm, 8), _round_up(M, 8))
    Mp = _round_up(M, TM)
    # Lane-dense hidden dim (multiple of 128).
    Hp = _round_up(max(H, 128), 128)

    # Pad / cast operands (zero-padding keeps the matmul + add exact on the
    # real H columns; padded columns are discarded on the final slice).
    x2 = _pad2d(x.reshape(M, H).astype(mm_dtype), Mp, Hp)
    add2 = _pad2d(add.reshape(M, H), Mp, Hp)                    # stays in out dtype
    w2 = _pad2d(w.astype(mm_dtype), Hp, Hp)
    b2 = _pad2d(b.astype(jnp.float32).reshape(1, H), 1, Hp)     # bias kept in f32

    grid = (Mp // TM,)

    # VMEM budget: resident weight + bias + double-buffered x/add/out tiles.
    needed = (
        Hp * Hp * mm_bytes            # weight (resident)
        + Hp * 4                      # bias (f32, resident)
        + 2 * TM * Hp * mm_bytes      # x tiles (double-buffered)
        + 2 * TM * Hp * io_bytes      # add tiles
        + 2 * TM * Hp * io_bytes      # out tiles
    )
    vmem_limit = int(min(needed + (4 << 20), 64 << 20))  # cap: legal on v7x too

    cost = pl.CostEstimate(
        flops=2 * Mp * Hp * Hp,
        transcendentals=0,
        bytes_accessed=Mp * Hp * (mm_bytes + 2 * io_bytes) + Hp * Hp * mm_bytes + Hp * 4,
    )

    out = pl.pallas_call(
        _applier_kernel,
        out_shape=jax.ShapeDtypeStruct((Mp, Hp), out_dtype),
        grid_spec=pltpu.PrefetchScalarGridSpec(
            num_scalar_prefetch=0,
            grid=grid,
            in_specs=[
                pl.BlockSpec((TM, Hp), lambda i: (i, 0)),   # x tile
                pl.BlockSpec((Hp, Hp), lambda i: (0, 0)),   # weight (VMEM-resident)
                pl.BlockSpec((1, Hp), lambda i: (0, 0)),    # bias   (VMEM-resident)
                pl.BlockSpec((TM, Hp), lambda i: (i, 0)),   # add tile (residual)
            ],
            out_specs=pl.BlockSpec((TM, Hp), lambda i: (i, 0)),
        ),
        compiler_params=pltpu.CompilerParams(
            dimension_semantics=("parallel",),   # independent row tiles -> megacore
            vmem_limit_bytes=vmem_limit,
        ),
        input_output_aliases={3: 0},             # reuse the `add` buffer for the output
        cost_estimate=cost,
    )(x2, w2, b2, add2)

    return out[:M, :H].reshape(B, S, H)


def reference_forward(x, add, w, b):
    return jnp.einsum("bsh,ho->bso", x, w) + b[None, None, :] + add


if __name__ == "__main__":
    B, S, H = 2, 8, 32
    key = jax.random.PRNGKey(0)
    kx, ka, kw, kb = jax.random.split(key, 4)

    x = jax.random.normal(kx, (B, S, H), dtype=jnp.float32)
    add = jax.random.normal(ka, (B, S, H), dtype=jnp.float32)
    # Deterministic synthetic parameters for model = Linear(H, H).
    w = jax.random.normal(kw, (H, H), dtype=jnp.float32) * (1.0 / jnp.sqrt(H))
    b = jax.random.normal(kb, (H,), dtype=jnp.float32) * 0.01

    ref = reference_forward(x, add, w, b)

    # f32 path (exact within tight tolerance).
    out = jax.block_until_ready(applier_forward(x, add, w, b))
    assert out.shape == (B, S, H)
    assert jnp.allclose(out, ref, atol=1e-4, rtol=1e-4), "f32 path mismatch vs reference"

    # bf16-operand / f32-accumulation fast path (halves weight VMEM + HBM traffic).
    out_bf16 = jax.block_until_ready(
        applier_forward(x, add, w, b, matmul_dtype=jnp.bfloat16))
    assert out_bf16.shape == (B, S, H)
    assert jnp.allclose(out_bf16, ref, atol=3e-2, rtol=3e-2), "bf16 path mismatch vs reference"

    print("KERNEL_OK")
</pallas_src>

<mosaic_0001>
module attributes {stable_mosaic.version = 11 : i64} {
  func.func @_applier_kernel(%arg0: i32, %arg1: memref<16x128xf32, #tpu.memory_space<vmem>>, %arg2: memref<128x128xf32, #tpu.memory_space<vmem>>, %arg3: memref<1x128xf32, #tpu.memory_space<vmem>>, %arg4: memref<16x128xf32, #tpu.memory_space<vmem>>, %arg5: memref<16x128xf32, #tpu.memory_space<vmem>>) attributes {dimension_semantics = [#tpu.dimension_semantics<parallel>], iteration_bounds = array<i64: 1>, scalar_prefetch = 0 : i64, scratch_operands = 0 : i64, tpu.core_type = #tpu.core_type<tc>, window_params = [{transform_indices = @transform_0, window_bounds = array<i64: 16, 128>}, {pipeline_mode = #tpu.pipeline_mode<synchronous>, transform_indices = @transform_1, window_bounds = array<i64: 128, 128>}, {pipeline_mode = #tpu.pipeline_mode<synchronous>, transform_indices = @transform_2, window_bounds = array<i64: 1, 128>}, {transform_indices = @transform_3, window_bounds = array<i64: 16, 128>}, {transform_indices = @transform_4, window_bounds = array<i64: 16, 128>}]} {
    %c0 = arith.constant 0 : index
    %c0_0 = arith.constant 0 : index
    %0 = vector.load %arg1[%c0, %c0_0] : memref<16x128xf32, #tpu.memory_space<vmem>>, vector<16x128xf32>
    %c0_1 = arith.constant 0 : index
    %c0_2 = arith.constant 0 : index
    %1 = vector.load %arg2[%c0_1, %c0_2] : memref<128x128xf32, #tpu.memory_space<vmem>>, vector<128x128xf32>
    %cst = arith.constant dense<0.000000e+00> : vector<16x128xf32>
    %2 = tpu.matmul %0, %1, %cst {dimension_numbers = #tpu.dot_dimension_numbers<[1], [0], [0], [1], [0, 0, 1, 1], [], []>} : vector<16x128xf32>, vector<128x128xf32>, vector<16x128xf32> -> vector<16x128xf32>
    %c0_3 = arith.constant 0 : index
    %c0_4 = arith.constant 0 : index
    %3 = vector.load %arg3[%c0_3, %c0_4] : memref<1x128xf32, #tpu.memory_space<vmem>>, vector<1x128xf32>
    %4 = vector.broadcast %3 : vector<1x128xf32> to vector<16x128xf32>
    %5 = arith.addf %2, %4 : vector<16x128xf32>
    %c0_5 = arith.constant 0 : index
    %c0_6 = arith.constant 0 : index
    %6 = vector.load %arg4[%c0_5, %c0_6] : memref<16x128xf32, #tpu.memory_space<vmem>>, vector<16x128xf32>
    %7 = arith.addf %5, %6 : vector<16x128xf32>
    %c0_7 = arith.constant 0 : index
    %c0_8 = arith.constant 0 : index
    %8 = vector.load %arg5[%c0_7, %c0_8] : memref<16x128xf32, #tpu.memory_space<vmem>>, vector<16x128xf32>
    tpu.vector_store %arg5[%c0_7, %c0_8], %7 {strides = array<i32>} : memref<16x128xf32, #tpu.memory_space<vmem>>, vector<16x128xf32>,
    return
  }
  func.func @transform_0(%arg0: i32) -> (i32, i32) {
    %c0_i32 = arith.constant 0 : i32
    %c0_i32_0 = arith.constant 0 : i32
    return %arg0, %c0_i32 : i32, i32
  }
  func.func @transform_1(%arg0: i32) -> (i32, i32) {
    %c0_i32 = arith.constant 0 : i32
    %c0_i32_0 = arith.constant 0 : i32
    %c0_i32_1 = arith.constant 0 : i32
    return %c0_i32, %c0_i32_0 : i32, i32
  }
  func.func @transform_2(%arg0: i32) -> (i32, i32) {
    %c0_i32 = arith.constant 0 : i32
    %c0_i32_0 = arith.constant 0 : i32
    %c0_i32_1 = arith.constant 0 : i32
    return %c0_i32, %c0_i32_0 : i32, i32
  }
  func.func @transform_3(%arg0: i32) -> (i32, i32) {
    %c0_i32 = arith.constant 0 : i32
    %c0_i32_0 = arith.constant 0 : i32
    return %arg0, %c0_i32 : i32, i32
  }
  func.func @transform_4(%arg0: i32) -> (i32, i32) {
    %c0_i32 = arith.constant 0 : i32
    %c0_i32_0 = arith.constant 0 : i32
    return %arg0, %c0_i32 : i32, i32
  }
}

</mosaic_0001>

<bundles_post_ra>
// kernel: tpu_custom_call.1
= control target key start
LH: loop header
LB: loop body
LE: loop exit
PB: predicated region body
PF: predicated region fallthrough
CT: control target
= control target key end

     0   :  { %9 = vsyncpa [#allocation3], 0  ;;  %s352_s0 = inlined_call_operand.vmem [shape: f32[16,128], index: 0, kind: input, shape index: {}]   ;;  %s353_s1 = inlined_call_operand.hbm [shape: f32[128,128], index: 1, kind: input, shape index: {}]   ;;  %s354_s2 = inlined_call_operand.vmem [shape: f32[1,128], index: 2, kind: input, shape index: {}]   ;;  %s355_s3 = inlined_call_operand.hbm [shape: f32[16,128], index: 3, kind: input, shape index: {}, may-alias: {3,4}]   ;;  %s356_s4 = inlined_call_operand.hbm [shape: f32[16,128], index: 4, kind: output, shape index: {}, may-alias: {3,4}]  }
   0x1   :  { %10 = vsyncpa [#allocation6], 0 }
   0x2   :  { %11 = vsyncpa [#allocation4], 0  ;;  %s295_s15 = smov [#allocation2]  }
   0x3   :  { %s19_s16 = sshll.u32 %s295_s15, 4  ;;  %s20_s16 = int_to_ptr.vmem [resolvable:$true] %s19_s16 }
   0x4   :  { %s237_s17 = scalar_lea.vmem %s20_s16, 2048  ;;  %p242_p1 = scmp.lt.s32.totalorder %s20_s16, %s20_s16 }
   0x5   :  { %p238_p0 = scmp.ne.s32.totalorder %s20_s16, %s237_s17  ;;  %p243_p2 = scmp.lt.s32.totalorder %s237_s17, %s237_s17 }
   0x7   :  { %p244_p3 = por %p243_p2, %p242_p1 }
   0x9   :  { %p245_p4 = pnand %p244_p3, %p238_p0 }
   0xb   :  { %248 = shalt.err (!%p245_p4)
}
   0xc   :  { %s296_s18 = smov 128   ;;  %s297_s19 = smov 8  }
   0xd   :  { %25 = dma.hbm_to_vmem [thread:$0]  %s353_s1, 2048, %s20_s16, [#allocation3], %s296_s18, %s296_s18, %s297_s19  }
   0xe   :  { %s298_s22 = smov [#allocation5]  }
   0xf   :  { %s33_s23 = sshll.u32 %s298_s22, 4  ;;  %s34_s23 = int_to_ptr.vmem [resolvable:$true] %s33_s23 }
  0x10   :  { %s257_s24 = scalar_lea.vmem %s34_s23, 256  ;;  %p262_p6 = scmp.lt.s32.totalorder %s34_s23, %s34_s23 }
  0x11   :  { %p258_p5 = scmp.ne.s32.totalorder %s34_s23, %s257_s24  ;;  %p263_p7 = scmp.lt.s32.totalorder %s257_s24, %s257_s24 }
  0x13   :  { %p264_p8 = por %p263_p7, %p262_p6 }
  0x15   :  { %p265_p9 = pnand %p264_p8, %p258_p5 }
  0x17   :  { %268 = shalt.err (!%p265_p9)
}
  0x18   :  { %39 = dma.hbm_to_vmem [thread:$0]  %s355_s3, 256, %s34_s23, [#allocation6], %s296_s18, %s296_s18, %s297_s19  }
  0x19   :  { %289 = dma.done.wait [#allocation3], 2048  }
  0x1a   :  { %290 = vsyncadd [#allocation3], 4294965248 }
  0x1b   :  { %291 = dma.done.wait [#allocation6], 256  }
  0x1c   :  { %292 = vsyncadd [#allocation6], 4294967040  ;;  %v63_v0 = vld [vmem:[#allocation2 + $0x78] sm:$0xff]  ;;  %v62_v1 = vld [vmem:[#allocation2 + $0x70] sm:$0xff]  ;;  %s299_s5 = smov [#allocation7]  }
  0x1d   :  { %189 = vmatprep.subr.mxu0 %v63_v0  ;;  %v61_v2 = vld [vmem:[#allocation2 + $0x68] sm:$0xff]  ;;  %v60_v3 = vld [vmem:[#allocation2 + $0x60] sm:$0xff]  ;;  %v59_v5 = vld [vmem:[#allocation2 + $0x58] sm:$0xff]  ;;  %s157_s6 = sshll.u32 %s299_s5, 4  ;;  %s158_s6 = int_to_ptr.vmem [resolvable:$true] %s157_s6 }
  0x1e   :  { %190 = vmatpush3.msra.mxu0 %v63_v0  ;;  %v46_v4 = vld [vmem:[%s352_s0] sm:$0xff]  ;;  %v58_v6 = vld [vmem:[#allocation2 + $0x50] sm:$0xff]  ;;  %v57_v7 = vld [vmem:[#allocation2 + $0x48] sm:$0xff]  ;;  %p274_p11 = scmp.lt.s32.totalorder %s158_s6, %s158_s6 }
  0x1f   :  { %191 = vmatprep.subr.mxu0 %v62_v1  ;;  %221 = vmatprep.mubr.f32.mxu0 %v46_v4  ;;  %v56_v8 = vld [vmem:[#allocation2 + $0x40] sm:$0xff]  ;;  %v55_v9 = vld [vmem:[#allocation2 + $0x38] sm:$0xff]  ;;  %v54_v10 = vld [vmem:[#allocation2 + $0x30] sm:$0xff] }
  0x20   :  { %192 = vmatpush3.msra.mxu0 %v62_v1  ;;  %v53_v11 = vld [vmem:[#allocation2 + $0x28] sm:$0xff]  ;;  %v52_v12 = vld [vmem:[#allocation2 + $0x20] sm:$0xff]  ;;  %v51_v13 = vld [vmem:[#allocation2 + $0x18] sm:$0xff] }
  0x21   :  { %193 = vmatprep.subr.mxu0 %v61_v2  ;;  %v50_v14 = vld [vmem:[#allocation2 + $0x10] sm:$0xff]  ;;  %v49_v15 = vld [vmem:[#allocation2 + $0x8] sm:$0xff]  ;;  %v48_v16 = vld [vmem:[#allocation2] sm:$0xff] }
  0x22   :  { %194 = vmatpush3.msra.mxu0 %v61_v2  ;;  %v47_v17 = vld [vmem:[%s352_s0 + $0x8] sm:$0xff]  ;;  %v170_v18 = vld [vmem:[%s354_s2] ss:$0 sm:$0xff]  ;;  %s269_s0 = scalar_lea.vmem %s158_s6, 256 }
  0x23   :  { %195 = vmatprep.subr.mxu0 %v60_v3  ;;  %v147_v20 = vld [vmem:[#allocation5 + $0x8] sm:$0xff]  ;;  %v146_v23 = vld [vmem:[#allocation5] sm:$0xff]  ;;  %p270_p10 = scmp.ne.s32.totalorder %s158_s6, %s269_s0  ;;  %p275_p12 = scmp.lt.s32.totalorder %s269_s0, %s269_s0 }
  0x24   :  { %196 = vmatpush3.msra.mxu0 %v60_v3 }
  0x25   :  { %197 = vmatprep.subr.mxu0 %v59_v5  ;;  %p276_p13 = por %p275_p12, %p274_p11 }
  0x26   :  { %198 = vmatpush3.msra.mxu0 %v59_v5 }
  0x27   :  { %199 = vmatprep.subr.mxu0 %v58_v6  ;;  %p277_p0 = pnand %p276_p13, %p270_p10 }
  0x28   :  { %200 = vmatpush3.msra.mxu0 %v58_v6 }
  0x29   :  { %201 = vmatprep.subr.mxu0 %v57_v7 }
  0x2a   :  { %202 = vmatpush3.msra.mxu0 %v57_v7 }
  0x2b   :  { %203 = vmatprep.subr.mxu0 %v56_v8 }
  0x2c   :  { %204 = vmatpush3.msra.mxu0 %v56_v8 }
  0x2d   :  { %205 = vmatprep.subr.mxu0 %v55_v9 }
  0x2e   :  { %206 = vmatpush3.msra.mxu0 %v55_v9 }
  0x2f   :  { %207 = vmatprep.subr.mxu0 %v54_v10 }
  0x30   :  { %208 = vmatpush3.msra.mxu0 %v54_v10 }
  0x31   :  { %209 = vmatprep.subr.mxu0 %v53_v11 }
  0x32   :  { %210 = vmatpush3.msra.mxu0 %v53_v11 }
  0x33   :  { %211 = vmatprep.subr.mxu0 %v52_v12 }
  0x34   :  { %212 = vmatpush3.msra.mxu0 %v52_v12 }
  0x35   :  { %213 = vmatprep.subr.mxu0 %v51_v13 }
  0x36   :  { %214 = vmatpush3.msra.mxu0 %v51_v13 }
  0x37   :  { %215 = vmatprep.subr.mxu0 %v50_v14 }
  0x38   :  { %216 = vmatpush3.msra.mxu0 %v50_v14 }
  0x39   :  { %217 = vmatprep.subr.mxu0 %v49_v15 }
  0x3a   :  { %218 = vmatpush3.msra.mxu0 %v49_v15 }
  0x3b   :  { %219 = vmatprep.subr.mxu0 %v48_v16 }
  0x3c   :  { %220 = vmatpush3.msra.mxu0 %v48_v16 }
  0x3d   :  { %222 = vmatmul.mubr.f32.vlgmr.msra.gmra.mxu0 %v47_v17 }
  0xfd   :  { %v223_v19 = vpop.f32.mrf.mxu0 }
  0xfe   :  { %v143_v21 = vadd.f32 %v223_v19, %v170_v18 }
  0xff   :  { %v137_v22 = vpop.f32.mrf.mxu0 }
 0x100   :  { %v149_v24 = vadd.f32 %v147_v20, %v143_v21  ;;  %v138_v25 = vadd.f32 %v170_v18, %v137_v22 }
 0x102   :  { %151 = vst [vmem:[#allocation7 + $0x8] sm:$0xff] %v149_v24  ;;  %v148_v26 = vadd.f32 %v146_v23, %v138_v25 }
 0x104   :  { %150 = vst [vmem:[#allocation7] sm:$0xff] %v148_v26 }
 0x105   :  { %280 = shalt.err (!%p277_p0)
}
 0x106   :  { %163 = dma.vmem_to_hbm [thread:$0]  %s158_s6, 256, %s356_s4, [#allocation4], %s296_s18, %s296_s18, %s297_s19  }
 0x107   :  { %293 = dma.done.wait [#allocation4], 256  }
 0x108   :  { %294 = vsyncadd [#allocation4], 4294967040 }
 0x109   :  { %167 = vsyncpa [#allocation3], 1 }
 0x10a   :  { %168 = vsyncpa [#allocation6], 1 }
 0x10b   :  { %169 = vsyncpa [#allocation4], 1 }

</bundles_post_ra>
